<compile_context>
chip_gen: v7x
topology: tpu7x:2x2x1
jax: 0.10.0
libtpu: 0.0.40
codegen_flags: <defaults>
</compile_context>

<pallas_src>
import functools

import jax
import jax.numpy as jnp
from jax.experimental import pallas as pl
from jax.experimental.pallas import tpu as pltpu


def _round_up(x, m):
    return ((x + m - 1) // m) * m


def _vmem_capacity_bytes():
    try:
        return int(pltpu.get_tpu_info().vmem_capacity_bytes)
    except Exception:
        return 64 * 1024 * 1024   # conservative: v7x per-core VMEM


# --------------------------------------------------------------------------
# Kernel 1: per-row-tile focal-loss partials (one EUP log per element,
# lane-dense packed output: row 0 = loss sum, row 1 = positive count).
# --------------------------------------------------------------------------
def _focal_partial_kernel(pred_ref, gt_ref, part_ref):
    pred = pred_ref[...].astype(jnp.float32)      # (row_tile, L)
    gt = gt_ref[...].astype(jnp.float32)          # (row_tile, L)

    pos = gt == 1.0
    one_m_pred = 1.0 - pred
    # Fused pos/neg branches -> a single EUP log per element, sign applied later:
    #   pos: (1-p)^2           * log(p + 1e-10)
    #   neg: ((1-g)^2 * p)^2   * log(1-p + 1e-10)
    # NOTE: assumes gt <= 1 (CenterNet heatmaps); zero-padded cells hit the neg
    # branch with coeff == 0, contributing exactly zero loss and zero positives.
    log_arg = jnp.where(pos, pred, one_m_pred) + 1e-10
    one_m_gt = 1.0 - gt
    t = one_m_gt * one_m_gt * pred
    coeff = jnp.where(pos, one_m_pred * one_m_pred, t * t)
    elem = coeff * jnp.log(log_arg)               # negated once in combine kernel

    loss_sum = jnp.sum(elem)
    npos_sum = jnp.sum(jnp.where(pos, 1.0, 0.0))

    # Pack both scalars into one full (8,128) vreg -> single unmasked store.
    row = jax.lax.broadcasted_iota(jnp.int32, (1, 8, 128), 1)
    lane = jax.lax.broadcasted_iota(jnp.int32, (1, 8, 128), 2)
    first = lane == 0
    part_ref[...] = (jnp.where(first & (row == 0), loss_sum, 0.0)
                     + jnp.where(first & (row == 1), npos_sum, 0.0))


# --------------------------------------------------------------------------
# Kernel 2: per-batch masked-L1 offset partials (native layout, in-kernel
# mask broadcast over the 2 offset channels).
# --------------------------------------------------------------------------
def _offset_partial_kernel(off_p_ref, off_g_ref, mask_ref, part_ref):
    op = off_p_ref[...].astype(jnp.float32)       # (1, 2, HW)
    og = off_g_ref[...].astype(jnp.float32)       # (1, 2, HW)
    m = mask_ref[...].astype(jnp.float32)         # (1, 1, HW) broadcast over ch

    l1_sum = jnp.sum(jnp.abs((op - og) * m))      # |p*m - g*m| == |(p-g)*m|
    mask_sum = jnp.sum(m)

    row = jax.lax.broadcasted_iota(jnp.int32, (1, 8, 128), 1)
    lane = jax.lax.broadcasted_iota(jnp.int32, (1, 8, 128), 2)
    first = lane == 0
    part_ref[...] = (jnp.where(first & (row == 0), l1_sum, 0.0)
                     + jnp.where(first & (row == 1), mask_sum, 0.0))


# --------------------------------------------------------------------------
# Kernel 3: final reduce of the partial slabs + weighted combine (scalar).
# --------------------------------------------------------------------------
def _combine_kernel(hm_part_ref, off_part_ref, out_ref, *, alpha, beta):
    hm = hm_part_ref[...]                         # (num_tiles, 8, 128)
    off = off_part_ref[...]                       # (B, 8, 128)
    hrow = jax.lax.broadcasted_iota(jnp.int32, hm.shape, 1)
    orow = jax.lax.broadcasted_iota(jnp.int32, off.shape, 1)

    loss_sum = jnp.sum(jnp.where(hrow == 0, hm, 0.0))
    num_pos = jnp.sum(jnp.where(hrow == 1, hm, 0.0))
    # NOTE: matches the PyTorch reference exactly — no clamp on num_pos or
    # mask.sum(); zero positives / all-zero mask give inf/nan, same as torch.
    heatmap_loss = -loss_sum / num_pos

    l1_sum = jnp.sum(jnp.where(orow == 0, off, 0.0))
    mask_sum = jnp.sum(jnp.where(orow == 1, off, 0.0))
    offset_loss = l1_sum / mask_sum

    out_ref[0, 0] = alpha * heatmap_loss + beta * offset_loss


# --------------------------------------------------------------------------
# Wrapper
# --------------------------------------------------------------------------
def centernet_loss(hm_pred, offset_pred, heatmap_gt, offset_gt, mask,
                   alpha=1.0, beta=1.0):
    """JAX/Pallas equivalent of CenterNetLoss.forward (NCHW inputs)."""
    B, C, H, W = hm_pred.shape
    hw = H * W
    R = B * C
    itemsize = jnp.dtype(hm_pred.dtype).itemsize

    # ---------------- per-generation VMEM sizing ----------------
    phys = _vmem_capacity_bytes()
    if phys >= 100 * 1024 * 1024:       # v5e / v6e: 128 MiB physical VMEM
        budget = 40 * 1024 * 1024       # 2 inputs x 2 pipeline buffers
        vmem_limit = 64 * 1024 * 1024
    else:                               # v7x: 64 MiB per core -> leave headroom
        budget = 28 * 1024 * 1024
        vmem_limit = 52 * 1024 * 1024

    # ---------------- heatmap path: row-tiled streaming ----------------
    L = _round_up(hw, 128)
    max_rows = max(8, (budget // (4 * L * itemsize)) // 8 * 8)

    if hw % 128 == 0 and R % 8 == 0:
        # Common case: NO jnp.pad HBM copy. Pick the largest multiple-of-8 row
        # tile that divides R and fits the VMEM budget.
        row_tile = 8
        for d in range(8, min(max_rows, R) + 1, 8):
            if R % d == 0:
                row_tile = d
        R_pad = R
        hm_p = hm_pred.reshape(R, hw)
        hm_g = heatmap_gt.reshape(R, hw)
    else:
        # Fallback: zero-pad (pred=0, gt=0 -> coeff==0 -> exactly zero loss and
        # zero positive count for padded cells).
        R8 = _round_up(R, 8)
        row_tile = min(max_rows, R8)
        R_pad = _round_up(R8, row_tile)
        hm_p = jnp.pad(hm_pred.reshape(R, hw), ((0, R_pad - R), (0, L - hw)))
        hm_g = jnp.pad(heatmap_gt.reshape(R, hw), ((0, R_pad - R), (0, L - hw)))

    num_tiles = R_pad // row_tile
    # TODO(synk): add a lane-tiling ("arbitrary") grid axis if even 8 rows x L
    # no longer fits the VMEM budget (extremely large spatial outputs).

    hm_part = pl.pallas_call(
        _focal_partial_kernel,
        out_shape=jax.ShapeDtypeStruct((num_tiles, 8, 128), jnp.float32),
        grid_spec=pltpu.PrefetchScalarGridSpec(
            num_scalar_prefetch=0,
            grid=(num_tiles,),
            in_specs=[pl.BlockSpec((row_tile, L), lambda i: (i, 0)),
                      pl.BlockSpec((row_tile, L), lambda i: (i, 0))],
            out_specs=pl.BlockSpec((1, 8, 128), lambda i: (i, 0, 0)),
        ),
        compiler_params=pltpu.CompilerParams(
            dimension_semantics=("parallel",),   # v7x: both TCs stream rows
            vmem_limit_bytes=vmem_limit,
        ),
    )(hm_p, hm_g)

    # ------------- offset path: native layout, streamed over batch -------------
    off_p = offset_pred.reshape(B, 2, hw)   # free reshapes: no transpose/pad copies
    off_g = offset_gt.reshape(B, 2, hw)
    mask_r = mask.reshape(B, 1, hw)
    # TODO(synk): also tile the hw axis here if a single (2, hw) slab is too big
    # for VMEM (extremely large spatial outputs).

    off_part = pl.pallas_call(
        _offset_partial_kernel,
        out_shape=jax.ShapeDtypeStruct((B, 8, 128), jnp.float32),
        grid_spec=pltpu.PrefetchScalarGridSpec(
            num_scalar_prefetch=0,
            grid=(B,),
            in_specs=[pl.BlockSpec((1, 2, hw), lambda b: (b, 0, 0)),
                      pl.BlockSpec((1, 2, hw), lambda b: (b, 0, 0)),
                      pl.BlockSpec((1, 1, hw), lambda b: (b, 0, 0))],
            out_specs=pl.BlockSpec((1, 8, 128), lambda b: (b, 0, 0)),
        ),
        compiler_params=pltpu.CompilerParams(
            dimension_semantics=("parallel",),
            vmem_limit_bytes=vmem_limit,
        ),
    )(off_p, off_g, mask_r)

    # ---------------- tiny combine kernel ----------------
    kernel3 = functools.partial(_combine_kernel,
                                alpha=float(alpha), beta=float(beta))
    out = pl.pallas_call(
        kernel3,
        out_shape=jax.ShapeDtypeStruct((1, 1), jnp.float32),
        in_specs=[pl.BlockSpec(memory_space=pltpu.MemorySpace.VMEM)] * 2,
        out_specs=pl.BlockSpec(memory_space=pltpu.MemorySpace.SMEM),
    )(hm_part, off_part)

    return out[0, 0]


if __name__ == "__main__":
    key = jax.random.PRNGKey(0)
    k1, k2, k3, k4 = jax.random.split(key, 4)

    B, C, H, W = 2, 4, 16, 16

    # predicted heatmap in (0, 1)
    hm_pred = jax.nn.sigmoid(jax.random.normal(k1, (B, C, H, W), dtype=jnp.float32))

    # ground-truth heatmap: values < 1 everywhere, exact 1.0 at keypoints
    heatmap_gt = 0.9 * jax.random.uniform(k2, (B, C, H, W), dtype=jnp.float32)
    heatmap_gt = heatmap_gt.at[:, :, 4, 4].set(1.0)
    heatmap_gt = heatmap_gt.at[:, :, 8, 10].set(1.0)

    offset_pred = jax.random.normal(k3, (B, 2, H, W), dtype=jnp.float32)
    offset_gt = jax.random.normal(k4, (B, 2, H, W), dtype=jnp.float32)

    # keypoint mask (B, 1, H, W) with ones at the keypoint locations
    mask = jnp.zeros((B, 1, H, W), dtype=jnp.float32)
    mask = mask.at[:, :, 4, 4].set(1.0)
    mask = mask.at[:, :, 8, 10].set(1.0)

    loss = centernet_loss(hm_pred, offset_pred, heatmap_gt, offset_gt, mask,
                          alpha=1.0, beta=1.0)
    jax.block_until_ready(loss)

    # pure-JAX reference check (same math as the PyTorch module)
    pos = heatmap_gt == 1.0
    neg = heatmap_gt < 1.0
    pos_l = jnp.where(pos, -((1 - hm_pred) ** 2) * jnp.log(hm_pred + 1e-10), 0.0)
    neg_l = jnp.where(neg, -((1 - heatmap_gt) ** 4) * (hm_pred ** 2)
                      * jnp.log(1 - hm_pred + 1e-10), 0.0)
    hm_loss_ref = (pos_l.sum() + neg_l.sum()) / pos.sum()
    off_loss_ref = jnp.abs(offset_pred * mask - offset_gt * mask).sum() / mask.sum()
    ref = hm_loss_ref + off_loss_ref
    assert jnp.allclose(loss, ref, rtol=1e-4, atol=1e-5), (loss, ref)

    print("KERNEL_OK")
</pallas_src>

<mosaic_0001>
module attributes {stable_mosaic.version = 11 : i64} {
  func.func @_focal_partial_kernel(%arg0: i32, %arg1: memref<8x256xf32, #tpu.memory_space<vmem>>, %arg2: memref<8x256xf32, #tpu.memory_space<vmem>>, %arg3: memref<1x8x128xf32, #tpu.memory_space<vmem>>) attributes {dimension_semantics = [#tpu.dimension_semantics<parallel>], iteration_bounds = array<i64: 1>, scalar_prefetch = 0 : i64, scratch_operands = 0 : i64, tpu.core_type = #tpu.core_type<tc>, window_params = [{transform_indices = @transform_0, window_bounds = array<i64: 8, 256>}, {transform_indices = @transform_1, window_bounds = array<i64: 8, 256>}, {transform_indices = @transform_2, window_bounds = array<i64: 1, 8, 128>}]} {
    %c0 = arith.constant 0 : index
    %c0_0 = arith.constant 0 : index
    %0 = vector.load %arg1[%c0, %c0_0] : memref<8x256xf32, #tpu.memory_space<vmem>>, vector<8x256xf32>
    %c0_1 = arith.constant 0 : index
    %c0_2 = arith.constant 0 : index
    %1 = vector.load %arg2[%c0_1, %c0_2] : memref<8x256xf32, #tpu.memory_space<vmem>>, vector<8x256xf32>
    %cst = arith.constant 1.000000e+00 : f32
    %2 = vector.broadcast %cst : f32 to vector<8x256xf32>
    %3 = arith.cmpf oeq, %1, %2 : vector<8x256xf32>
    %cst_3 = arith.constant 1.000000e+00 : f32
    %4 = vector.broadcast %cst_3 : f32 to vector<8x256xf32>
    %5 = arith.subf %4, %0 : vector<8x256xf32>
    %6 = arith.select %3, %0, %5 : vector<8x256xi1>, vector<8x256xf32>
    %cst_4 = arith.constant 1.000000e-10 : f32
    %7 = vector.broadcast %cst_4 : f32 to vector<8x256xf32>
    %8 = arith.addf %6, %7 : vector<8x256xf32>
    %cst_5 = arith.constant 1.000000e+00 : f32
    %9 = vector.broadcast %cst_5 : f32 to vector<8x256xf32>
    %10 = arith.subf %9, %1 : vector<8x256xf32>
    %11 = arith.mulf %10, %10 : vector<8x256xf32>
    %12 = arith.mulf %11, %0 : vector<8x256xf32>
    %13 = arith.mulf %5, %5 : vector<8x256xf32>
    %14 = arith.mulf %12, %12 : vector<8x256xf32>
    %15 = arith.select %3, %13, %14 : vector<8x256xi1>, vector<8x256xf32>
    %16 = math.log %8 : vector<8x256xf32>
    %17 = arith.mulf %15, %16 : vector<8x256xf32>
    %18 = vector.shape_cast %17 : vector<8x256xf32> to vector<1x8x256xf32>
    %cst_6 = arith.constant dense<0.000000e+00> : vector<1xf32>
    %19 = vector.multi_reduction <add>, %18, %cst_6 [1, 2] : vector<1x8x256xf32> to vector<1xf32>
    %20 = vector.shape_cast %19 : vector<1xf32> to vector<1x1x1xf32>
    %21 = vector.extract %20[0, 0, 0] : f32 from vector<1x1x1xf32>
    %cst_7 = arith.constant 1.000000e+00 : f32
    %cst_8 = arith.constant 0.000000e+00 : f32
    %22 = vector.broadcast %cst_7 : f32 to vector<8x256xf32>
    %23 = vector.broadcast %cst_8 : f32 to vector<8x256xf32>
    %24 = arith.select %3, %22, %23 : vector<8x256xi1>, vector<8x256xf32>
    %25 = vector.shape_cast %24 : vector<8x256xf32> to vector<1x8x256xf32>
    %cst_9 = arith.constant dense<0.000000e+00> : vector<1xf32>
    %26 = vector.multi_reduction <add>, %25, %cst_9 [1, 2] : vector<1x8x256xf32> to vector<1xf32>
    %27 = vector.shape_cast %26 : vector<1xf32> to vector<1x1x1xf32>
    %28 = vector.extract %27[0, 0, 0] : f32 from vector<1x1x1xf32>
    %29 = tpu.iota {dimensions = array<i32: 1>} : vector<1x8x128xi32>
    %30 = tpu.iota {dimensions = array<i32: 2>} : vector<1x8x128xi32>
    %c0_i32 = arith.constant 0 : i32
    %31 = vector.broadcast %c0_i32 : i32 to vector<1x8x128xi32>
    %32 = arith.cmpi eq, %30, %31 : vector<1x8x128xi32>
    %c0_i32_10 = arith.constant 0 : i32
    %33 = vector.broadcast %c0_i32_10 : i32 to vector<1x8x128xi32>
    %34 = arith.cmpi eq, %29, %33 : vector<1x8x128xi32>
    %35 = arith.andi %32, %34 : vector<1x8x128xi1>
    %cst_11 = arith.constant 0.000000e+00 : f32
    %36 = vector.broadcast %21 : f32 to vector<1x8x128xf32>
    %37 = vector.broadcast %cst_11 : f32 to vector<1x8x128xf32>
    %38 = arith.select %35, %36, %37 : vector<1x8x128xi1>, vector<1x8x128xf32>
    %c1_i32 = arith.constant 1 : i32
    %39 = vector.broadcast %c1_i32 : i32 to vector<1x8x128xi32>
    %40 = arith.cmpi eq, %29, %39 : vector<1x8x128xi32>
    %41 = arith.andi %32, %40 : vector<1x8x128xi1>
    %cst_12 = arith.constant 0.000000e+00 : f32
    %42 = vector.broadcast %28 : f32 to vector<1x8x128xf32>
    %43 = vector.broadcast %cst_12 : f32 to vector<1x8x128xf32>
    %44 = arith.select %41, %42, %43 : vector<1x8x128xi1>, vector<1x8x128xf32>
    %45 = arith.addf %38, %44 : vector<1x8x128xf32>
    %c0_13 = arith.constant 0 : index
    %c0_14 = arith.constant 0 : index
    %c0_15 = arith.constant 0 : index
    %46 = vector.load %arg3[%c0_13, %c0_14, %c0_15] : memref<1x8x128xf32, #tpu.memory_space<vmem>>, vector<1x8x128xf32>
    tpu.vector_store %arg3[%c0_13, %c0_14, %c0_15], %45 {strides = array<i32>} : memref<1x8x128xf32, #tpu.memory_space<vmem>>, vector<1x8x128xf32>,
    return
  }
  func.func @transform_0(%arg0: i32) -> (i32, i32) {
    %c0_i32 = arith.constant 0 : i32
    %c0_i32_0 = arith.constant 0 : i32
    return %arg0, %c0_i32 : i32, i32
  }
  func.func @transform_1(%arg0: i32) -> (i32, i32) {
    %c0_i32 = arith.constant 0 : i32
    %c0_i32_0 = arith.constant 0 : i32
    return %arg0, %c0_i32 : i32, i32
  }
  func.func @transform_2(%arg0: i32) -> (i32, i32, i32) {
    %c0_i32 = arith.constant 0 : i32
    %c0_i32_0 = arith.constant 0 : i32
    %c0_i32_1 = arith.constant 0 : i32
    return %arg0, %c0_i32, %c0_i32_0 : i32, i32, i32
  }
}

</mosaic_0001>

<bundles_post_ra>
// kernel: tpu_custom_call.1
= control target key start
LH: loop header
LB: loop body
LE: loop exit
PB: predicated region body
PF: predicated region fallthrough
CT: control target
= control target key end

     0   :  { %7 = vsyncpa [#allocation3], 0  ;;  %s264_s0 = inlined_call_operand.hbm [shape: f32[8,256], index: 0, kind: input, shape index: {}]   ;;  %s265_s1 = inlined_call_operand.hbm [shape: f32[8,256], index: 1, kind: input, shape index: {}]   ;;  %s266_s2 = inlined_call_operand.hbm [shape: f32[1,8,128], index: 2, kind: output, shape index: {}]  }
   0x1   :  { %8 = vsyncpa [#allocation6], 0 }
   0x2   :  { %9 = vsyncpa [#allocation4], 0  ;;  %s203_s9 = smov [#allocation2]   ;;  %s204_s11 = smov [#allocation5]  }
   0x3   :  { %s16_s10 = sshll.u32 %s203_s9, 4  ;;  %s26_s12 = sshll.u32 %s204_s11, 4  ;;  %s17_s10 = int_to_ptr.vmem [resolvable:$true] %s16_s10  ;;  %s27_s12 = int_to_ptr.vmem [resolvable:$true] %s26_s12 }
   0x4   :  { %s131_s15 = scalar_lea.hbm %s264_s0, 256 }
   0x5   :  { %p132_p0 = scmp.ne.s32.totalorder %s264_s0, %s131_s15  ;;  %p135_p1 = scmp.lt.u32.totalorder %s131_s15, %s264_s0 }
   0x7   :  { %p137_p2 = pnand %p135_p1, %p132_p0 }
   0x9   :  { %140 = shalt.err (!%p137_p2)
}
   0xa   :  { %s141_s20 = scalar_lea.vmem %s17_s10, 256  ;;  %p146_p4 = scmp.lt.s32.totalorder %s17_s10, %s17_s10 }
   0xb   :  { %p142_p3 = scmp.ne.s32.totalorder %s17_s10, %s141_s20  ;;  %p147_p5 = scmp.lt.s32.totalorder %s141_s20, %s141_s20 }
   0xd   :  { %p148_p6 = por %p147_p5, %p146_p4 }
   0xf   :  { %p149_p7 = pnand %p148_p6, %p142_p3 }
  0x11   :  { %152 = shalt.err (!%p149_p7)
}
  0x12   :  { %19 = dma.hbm_to_vmem [thread:$0]  %s264_s0, 256, %s17_s10, [#allocation3]  }
  0x13   :  { %s153_s25 = scalar_lea.hbm %s265_s1, 256 }
  0x14   :  { %p154_p8 = scmp.ne.s32.totalorder %s265_s1, %s153_s25  ;;  %p157_p9 = scmp.lt.u32.totalorder %s153_s25, %s265_s1 }
  0x16   :  { %p159_p10 = pnand %p157_p9, %p154_p8 }
  0x18   :  { %162 = shalt.err (!%p159_p10)
}
  0x19   :  { %s163_s30 = scalar_lea.vmem %s27_s12, 256  ;;  %p168_p12 = scmp.lt.s32.totalorder %s27_s12, %s27_s12 }
  0x1a   :  { %p164_p11 = scmp.ne.s32.totalorder %s27_s12, %s163_s30  ;;  %p169_p13 = scmp.lt.s32.totalorder %s163_s30, %s163_s30 }
  0x1c   :  { %p170_p0 = por %p169_p13, %p168_p12 }
  0x1e   :  { %p171_p1 = pnand %p170_p0, %p164_p11 }
  0x20   :  { %174 = shalt.err (!%p171_p1)
}
  0x21   :  { %29 = dma.hbm_to_vmem [thread:$0]  %s265_s1, 256, %s27_s12, [#allocation6]  }
  0x22   :  { %197 = dma.done.wait [#allocation3], 256  }
  0x23   :  { %198 = vsyncadd [#allocation3], 4294967040 }
  0x24   :  { %199 = dma.done.wait [#allocation6], 256  }
  0x25   :  { %200 = vsyncadd [#allocation6], 4294967040  ;;  %v36_v0 = vld [vmem:[#allocation2] sm:$0xff]  ;;  %v37_v1 = vld [vmem:[#allocation2 + $0x8] sm:$0xff]  ;;  %v205_v28 = vmov 0.0   ;;  %v88_v47 = vlaneseq  ;;  %s206_s5 = smov [#allocation7]  }
  0x26   :  { %v38_v2 = vld [vmem:[#allocation5] sm:$0xff]  ;;  %v39_v3 = vld [vmem:[#allocation5 + $0x8] sm:$0xff]  ;;  %v42_v4 = vsub.f32 1.0, %v36_v0  ;;  %v43_v5 = vsub.f32 1.0, %v37_v1  ;;  %s109_s6 = sshll.u32 %s206_s5, 4  ;;  %s110_s6 = int_to_ptr.vmem [resolvable:$true] %s109_s6 }
  0x27   :  { %vm40_vm0 = vcmp.eq.f32.partialorder %v38_v2, 1.0  ;;  %v48_v6 = vsub.f32 1.0, %v38_v2  ;;  %vm41_vm1 = vcmp.eq.f32.partialorder %v39_v3, 1.0  ;;  %v49_v7 = vsub.f32 1.0, %v39_v3  ;;  %s175_s7 = scalar_lea.vmem %s110_s6, 128  ;;  %p180_p3 = scmp.lt.s32.totalorder %s110_s6, %s110_s6 }
  0x28   :  { %v44_v8 = vsel %vm40_vm0, %v36_v0, %v42_v4  ;;  %v45_v9 = vsel %vm41_vm1, %v37_v1, %v43_v5  ;;  %v54_v16 = vmul.f32 %v42_v4, %v42_v4  ;;  %v55_v18 = vmul.f32 %v43_v5, %v43_v5  ;;  %p176_p2 = scmp.ne.s32.totalorder %s110_s6, %s175_s7  ;;  %p181_p4 = scmp.lt.s32.totalorder %s175_s7, %s175_s7 }
  0x29   :  { %v46_v10 = vadd.f32 1e-10, %v44_v8  ;;  %v47_v11 = vadd.f32 1e-10, %v45_v9  ;;  %v50_v12 = vmul.f32 %v48_v6, %v48_v6  ;;  %v51_v13 = vmul.f32 %v49_v7, %v49_v7 }
  0x2a   :  { %v76_v29 = vsel %vm40_vm0, 1.0, %v205_v28  ;;  %v77_v30 = vsel %vm41_vm1, 1.0, %v205_v28  ;;  %v89_v48 = vshrl.u32 %v88_v47, 7  ;;  %v91_v49 = vand.u32 127, %v88_v47  ;;  %p182_p5 = por %p181_p4, %p180_p3 }
  0x2b   :  { %127 = vlog2.f32 %v46_v10  ;;  %v52_v14 = vmul.f32 %v50_v12, %v36_v0  ;;  %v53_v15 = vmul.f32 %v51_v13, %v37_v1  ;;  %v78_v32 = vadd.f32 %v77_v30, %v76_v29 }
  0x2c   :  { %129 = vlog2.f32 %v47_v11  ;;  %vm92_vm2 = vcmp.eq.s32.totalorder %v91_v49, 0  ;;  %vm93_vm3 = vcmp.eq.s32.totalorder %v89_v48, 0  ;;  %vm97_vm4 = vcmp.eq.s32.totalorder %v89_v48, 1  ;;  %p183_p6 = pnand %p182_p5, %p176_p2 }
  0x2d   :  { %v56_v17 = vmul.f32 %v52_v14, %v52_v14  ;;  %v57_v19 = vmul.f32 %v53_v15, %v53_v15  ;;  %vm94_vm5 = vmand %vm92_vm2, %vm93_vm3 }
  0x2e   :  { %vm98_vm6 = vmand %vm92_vm2, %vm97_vm4 }
  0x2f   :  { %v58_v21 = vsel %vm40_vm0, %v54_v16, %v56_v17  ;;  %v59_v23 = vsel %vm41_vm1, %v55_v18, %v57_v19 }
  0x35   :  { %v128_v20 = vpop.eup %127 }
  0x36   :  { %v130_v22 = vpop.eup %129  ;;  %v61_v24 = vmul.f32 0.6931472, %v128_v20 }
  0x37   :  { %v63_v25 = vmul.f32 0.6931472, %v130_v22 }
  0x38   :  { %v64_v26 = vmul.f32 %v61_v24, %v58_v21 }
  0x39   :  { %v65_v27 = vmul.f32 %v63_v25, %v59_v23 }
  0x3b   :  { %v66_v31 = vadd.f32 %v65_v27, %v64_v26 }
  0x3d   :  { %67 = vadd.xlane.f32.xlu0 %v66_v31 }
  0x41   :  { %79 = vadd.xlane.f32.xlu0 %v78_v32 }
  0xca   :  { %v68_v33 = vpop.xlane.xlu0 %67 }
  0xcb   :  { %v69_v34 = vrot.slane %v68_v33, 4 }
  0xcd   :  { %v70_v35 = vadd.f32 %v69_v34, %v68_v33 }
  0xce   :  { %v80_v36 = vpop.xlane.xlu0 %79 }
  0xcf   :  { %v71_v37 = vrot.slane %v70_v35, 2  ;;  %v81_v38 = vrot.slane %v80_v36, 4 }
  0xd1   :  { %v82_v39 = vadd.f32 %v81_v38, %v80_v36  ;;  %v72_v40 = vadd.f32 %v71_v37, %v70_v35 }
  0xd3   :  { %v83_v41 = vrot.slane %v82_v39, 2  ;;  %v73_v42 = vrot.slane %v72_v40, 1 }
  0xd5   :  { %v84_v43 = vadd.f32 %v83_v41, %v82_v39  ;;  %v74_v44 = vadd.f32 %v73_v42, %v72_v40 }
  0xd7   :  { %119 = vpush %v74_v44  ;;  %v85_v45 = vrot.slane %v84_v43, 1 }
  0xd9   :  { %v86_v46 = vadd.f32 %v85_v45, %v84_v43 }
  0xdb   :  { %121 = vpush %v86_v46 }
 0x108   :  { %s120_s1 = spop %119 }
 0x109   :  { %v95_v50 = vstv %s120_s1 }
 0x10a   :  { %v96_v52 = vsel %vm94_vm5, %v95_v50, 0.0 }
 0x10c   :  { %s122_s4 = spop %121 }
 0x10d   :  { %v99_v51 = vstv %s122_s4 }
 0x10e   :  { %v100_v53 = vsel %vm98_vm6, %v99_v51, 0.0 }
 0x10f   :  { %v101_v54 = vadd.f32 %v100_v53, %v96_v52 }
 0x111   :  { %102 = vst [vmem:[#allocation7] sm:$0xff] %v101_v54 }
 0x112   :  { %186 = shalt.err (!%p183_p6)
}
 0x113   :  { %s187_s10 = scalar_lea.hbm %s266_s2, 128 }
 0x114   :  { %p188_p7 = scmp.ne.s32.totalorder %s266_s2, %s187_s10  ;;  %p191_p8 = scmp.lt.u32.totalorder %s187_s10, %s266_s2 }
 0x116   :  { %p193_p9 = pnand %p191_p8, %p188_p7 }
 0x118   :  { %196 = shalt.err (!%p193_p9)
}
 0x119   :  { %112 = dma.vmem_to_hbm [thread:$0]  %s110_s6, 128, %s266_s2, [#allocation4]  }
 0x11a   :  { %201 = dma.done.wait [#allocation4], 128  }
 0x11b   :  { %202 = vsyncadd [#allocation4], 4294967168 }
 0x11c   :  { %116 = vsyncpa [#allocation3], 1 }
 0x11d   :  { %117 = vsyncpa [#allocation6], 1 }
 0x11e   :  { %118 = vsyncpa [#allocation4], 1 }

</bundles_post_ra>
